<compile_context>
chip_gen: v7x
topology: tpu7x:2x2x1
jax: 0.10.0
libtpu: 0.0.40
codegen_flags: <defaults>
</compile_context>

<pallas_src>
import math

import jax
import jax.numpy as jnp
from jax.experimental import pallas as pl
from jax.experimental.pallas import tpu as pltpu


def _make_kernel(packed: bool):
    """Kernel body.

    packed=False: td block (tile_m, 1), w/(1+b) blocks (1, tile_d) -> VPU
                  broadcast FMA.
    packed=True : td block (tile_m, 8) (k real columns + zero padding), w block
                  (8, k*D) block-diagonal -> skinny MXU matmul does both the
                  lane expansion and the weight multiply in one op.
    """

    def kernel(td_ref, w_ref, opb_ref, h_ref, o_ref):
        td = td_ref[...]                              # f32
        if packed:
            # MXU is idle in this kernel; HIGHEST keeps full f32 accuracy.
            scale = jnp.dot(td, w_ref[...],
                            preferred_element_type=jnp.float32,
                            precision=jax.lax.Precision.HIGHEST) + opb_ref[...]
        else:
            # (tile_m, 1) * (1, tile_d) + (1, tile_d): broadcast FMA on the VPU.
            scale = td * w_ref[...] + opb_ref[...]
        o_ref[...] = (h_ref[...].astype(jnp.float32) * scale).astype(o_ref.dtype)

    return kernel


def jodie_time_embedding(h, mem_ts, ts, weight, bias, *,
                         block_bytes: int = 4 * 1024 * 1024,
                         vmem_budget_bytes: int = 12 * 1024 * 1024):
    """JODIE time embedding forward.

    h:      [N, D]   (any float dtype; output matches it)
    mem_ts: [N]
    ts:     [N]
    weight: [D, 1]   (PyTorch Linear(1, D) layout)
    bias:   [D]
    """
    N, D = h.shape
    out_dtype = h.dtype
    itemsize = jnp.dtype(out_dtype).itemsize

    # ---- tiny wrapper-side precompute (fuses in XLA) ------------------------
    ts_f = ts.astype(jnp.float32)
    td = (ts_f - mem_ts.astype(jnp.float32)) / (ts_f + 1.0)          # [N] f32
    w_row = weight.astype(jnp.float32).reshape(1, D)                  # (1, D)
    opb_row = 1.0 + bias.astype(jnp.float32).reshape(1, D)            # 1 + b

    # ---- lane-dense packing for narrow D (pure reshapes + tiny pads) --------
    k = 128 // D if (D < 128 and 128 % D == 0) else 1
    if k > 1:
        pad_rows = (-N) % k
        if pad_rows:
            h = jnp.pad(h, ((0, pad_rows), (0, 0)))
            td = jnp.pad(td, (0, pad_rows))
        n_rows = (N + pad_rows) // k
        dp = k * D
        h2 = h.reshape(n_rows, dp)
        td2 = td.reshape(n_rows, k)
        # Block-diagonal weight: W_bd[j, j*D + d] = w[d]; the in-kernel matmul
        # expands td[:, j] onto lanes [j*D, (j+1)*D) and applies w in one shot.
        w_in = jnp.kron(jnp.eye(k, dtype=jnp.float32), w_row)         # (k, k*D)
        if k < 8:
            # Pad the contraction dim to the f32 sublane tile (zero rows/cols
            # contribute exactly 0); keeps the RHS a single aligned vreg tile.
            td2 = jnp.pad(td2, ((0, 0), (0, 8 - k)))
            w_in = jnp.pad(w_in, ((0, 8 - k), (0, 0)))
        opb_in = jnp.tile(opb_row, (1, k))                            # (1, k*D)
    else:
        n_rows, dp = N, D
        h2 = h
        td2 = td.reshape(n_rows, 1)
        w_in = w_row
        opb_in = opb_row
    k_cols = td2.shape[1]
    k_w = w_in.shape[0]

    # ---- tile selection ------------------------------------------------------
    # Feature split only for very wide D (keeps the weight stripe resident and
    # bounds per-block VMEM); otherwise one stripe covers all of dp.
    if dp > 1024 and dp % 128 == 0:
        tile_d = 1024
        while dp % tile_d != 0:
            tile_d //= 2          # terminates at 128, which divides dp
    else:
        tile_d = dp

    # Sublane packing of the output dtype: 8 (f32) / 16 (bf16) / 32 (1-byte).
    row_align = max(8, 32 // itemsize)

    # (a) per-block byte target for the h tile.
    rows_from_block = max(row_align, block_bytes // max(1, tile_d * itemsize))
    # (b) total double-buffered VMEM budget: h-in + out blocks in h.dtype plus
    #     the td block, which is lane-padded to 128 f32 words per row in VMEM.
    per_row_bytes = 2 * (2 * tile_d * itemsize + 128 * 4)
    rows_from_vmem = max(row_align, vmem_budget_bytes // per_row_bytes)
    # (c) minimum number of row tiles: keeps in/out DMA double-buffering active
    #     and lets v7x shard the ("parallel") row axis across both TensorCores.
    traffic_bytes = 2 * n_rows * dp * itemsize
    if traffic_bytes >= 4 * 1024 * 1024:
        min_row_tiles = 4
    elif traffic_bytes >= 512 * 1024:
        min_row_tiles = 2
    else:
        min_row_tiles = 1
    rows_from_split = pl.cdiv(n_rows, min_row_tiles)

    rows = min(rows_from_block, rows_from_vmem, rows_from_split)
    if rows >= n_rows:
        tile_m = n_rows                       # single full block (tiny problems)
    else:
        tile_m = max(row_align, (rows // row_align) * row_align)
        tile_m = min(tile_m, n_rows)

    grid = (pl.cdiv(n_rows, tile_m), pl.cdiv(dp, tile_d))

    # Resident-VMEM estimate (double-buffered blocks; td lane-padded to 128).
    est = (2 * (2 * tile_m * tile_d * itemsize + tile_m * 128 * 4)
           + 2 * 2 * (k_w + 1) * max(tile_d, 128) * 4)
    vmem_limit = int(min(max(2 * est, 16 * 1024 * 1024), 48 * 1024 * 1024))

    out2 = pl.pallas_call(
        _make_kernel(k > 1),
        out_shape=jax.ShapeDtypeStruct((n_rows, dp), out_dtype),
        grid_spec=pltpu.PrefetchScalarGridSpec(
            num_scalar_prefetch=0,
            grid=grid,
            in_specs=[
                pl.BlockSpec((tile_m, k_cols), lambda i, j: (i, 0)),    # td
                pl.BlockSpec((k_w, tile_d), lambda i, j: (0, j)),       # w / W_bd
                pl.BlockSpec((1, tile_d), lambda i, j: (0, j)),         # 1 + b
                pl.BlockSpec((tile_m, tile_d), lambda i, j: (i, j)),    # h
            ],
            out_specs=pl.BlockSpec((tile_m, tile_d), lambda i, j: (i, j)),
        ),
        compiler_params=pltpu.CompilerParams(
            # Elementwise over rows and features -> shard across v7x's two
            # TensorCores; no-op on single-TC v5e/v6e.
            dimension_semantics=("parallel", "parallel"),
            vmem_limit_bytes=vmem_limit),
    )(td2, w_in, opb_in, h2)

    if k > 1:
        return out2.reshape(-1, D)[:N]
    return out2


def jodie_time_embedding_ref(h, mem_ts, ts, weight, bias):
    td = (ts - mem_ts) / (ts + 1.0)
    emb = td[:, None] * weight.reshape(1, -1) + bias[None, :]
    return h.astype(jnp.float32) * (1.0 + emb)


if __name__ == "__main__":
    key = jax.random.PRNGKey(0)

    def make_inputs(key, n, d, dtype):
        k_h, k_mem, k_ts, k_w, k_b = jax.random.split(key, 5)
        h = jax.random.normal(k_h, (n, d), dtype=jnp.float32).astype(dtype)
        ts = jax.random.uniform(k_ts, (n,), jnp.float32, minval=1.0, maxval=10.0)
        mem_ts = ts - jax.random.uniform(k_mem, (n,), jnp.float32,
                                         minval=0.0, maxval=5.0)
        # NormalLinear init: stdv = 1/sqrt(in_features=1)
        stdv = 1.0 / math.sqrt(1.0)
        weight = stdv * jax.random.normal(k_w, (d, 1), dtype=jnp.float32)
        bias = stdv * jax.random.normal(k_b, (d,), dtype=jnp.float32)
        return h, mem_ts, ts, weight, bias

    # (N, D, dtype, block_bytes)
    configs = [
        (1024, 32, jnp.float32, None),     # D<128 -> lane-packed (k=4), MXU expand
        (1000, 32, jnp.bfloat16, None),    # bf16 I/O, packed, tile_m = full rows
        (1023, 32, jnp.float32, None),     # N % k != 0 -> wrapper row padding
        (64, 256, jnp.float32, None),      # D>=128 -> plain broadcast-FMA path
        (1000, 32, jnp.float32, 64 * 1024),   # multi-tile grid + masked edge block
        (4096, 128, jnp.float32, None),    # traffic >= 4 MiB -> >=4 row tiles
    ]
    for (n, d, dt, bb) in configs:
        key, sub = jax.random.split(key)
        h, mem_ts, ts, w, b = make_inputs(sub, n, d, dt)
        kwargs = {} if bb is None else {"block_bytes": bb}
        out = jax.block_until_ready(
            jodie_time_embedding(h, mem_ts, ts, w, b, **kwargs))
        ref = jodie_time_embedding_ref(h, mem_ts, ts, w, b)
        assert out.shape == (n, d) and out.dtype == dt
        tol = (dict(atol=1e-5, rtol=1e-5) if dt == jnp.float32
               else dict(atol=2e-2, rtol=2e-2))
        assert jnp.allclose(out.astype(jnp.float32), ref, **tol), \
            f"mismatch for config {(n, d, dt, bb)}"

    print("KERNEL_OK")
</pallas_src>

<mosaic_0001>
module attributes {stable_mosaic.version = 11 : i64} {
  func.func @kernel(%arg0: i32, %arg1: i32, %arg2: memref<256x8xf32, #tpu.memory_space<vmem>>, %arg3: memref<8x128xf32, #tpu.memory_space<vmem>>, %arg4: memref<1x128xf32, #tpu.memory_space<vmem>>, %arg5: memref<256x128xf32, #tpu.memory_space<vmem>>, %arg6: memref<256x128xf32, #tpu.memory_space<vmem>>) attributes {dimension_semantics = [#tpu.dimension_semantics<parallel>, #tpu.dimension_semantics<parallel>], iteration_bounds = array<i64: 1, 1>, scalar_prefetch = 0 : i64, scratch_operands = 0 : i64, tpu.core_type = #tpu.core_type<tc>, window_params = [{transform_indices = @transform_0, window_bounds = array<i64: 256, 8>}, {transform_indices = @transform_1, window_bounds = array<i64: 8, 128>}, {transform_indices = @transform_2, window_bounds = array<i64: 1, 128>}, {transform_indices = @transform_3, window_bounds = array<i64: 256, 128>}, {transform_indices = @transform_4, window_bounds = array<i64: 256, 128>}]} {
    %c0 = arith.constant 0 : index
    %c0_0 = arith.constant 0 : index
    %0 = vector.load %arg2[%c0, %c0_0] : memref<256x8xf32, #tpu.memory_space<vmem>>, vector<256x8xf32>
    %c0_1 = arith.constant 0 : index
    %c0_2 = arith.constant 0 : index
    %1 = vector.load %arg3[%c0_1, %c0_2] : memref<8x128xf32, #tpu.memory_space<vmem>>, vector<8x128xf32>
    %cst = arith.constant dense<0.000000e+00> : vector<256x128xf32>
    %2 = tpu.matmul %0, %1, %cst {dimension_numbers = #tpu.dot_dimension_numbers<[1], [0], [0], [1], [0, 0, 1, 1], [], []>, precision = #tpu.contract_precision<fp32>} : vector<256x8xf32>, vector<8x128xf32>, vector<256x128xf32> -> vector<256x128xf32>
    %c0_3 = arith.constant 0 : index
    %c0_4 = arith.constant 0 : index
    %3 = vector.load %arg4[%c0_3, %c0_4] : memref<1x128xf32, #tpu.memory_space<vmem>>, vector<1x128xf32>
    %4 = vector.broadcast %3 : vector<1x128xf32> to vector<256x128xf32>
    %5 = arith.addf %2, %4 : vector<256x128xf32>
    %c0_5 = arith.constant 0 : index
    %c0_6 = arith.constant 0 : index
    %6 = vector.load %arg5[%c0_5, %c0_6] : memref<256x128xf32, #tpu.memory_space<vmem>>, vector<256x128xf32>
    %7 = arith.mulf %6, %5 : vector<256x128xf32>
    %c0_7 = arith.constant 0 : index
    %c0_8 = arith.constant 0 : index
    %8 = vector.load %arg6[%c0_7, %c0_8] : memref<256x128xf32, #tpu.memory_space<vmem>>, vector<256x128xf32>
    tpu.vector_store %arg6[%c0_7, %c0_8], %7 {strides = array<i32>} : memref<256x128xf32, #tpu.memory_space<vmem>>, vector<256x128xf32>,
    return
  }
  func.func @transform_0(%arg0: i32, %arg1: i32) -> (i32, i32) {
    %c0_i32 = arith.constant 0 : i32
    %c0_i32_0 = arith.constant 0 : i32
    return %arg0, %c0_i32 : i32, i32
  }
  func.func @transform_1(%arg0: i32, %arg1: i32) -> (i32, i32) {
    %c0_i32 = arith.constant 0 : i32
    %c0_i32_0 = arith.constant 0 : i32
    return %c0_i32, %arg1 : i32, i32
  }
  func.func @transform_2(%arg0: i32, %arg1: i32) -> (i32, i32) {
    %c0_i32 = arith.constant 0 : i32
    %c0_i32_0 = arith.constant 0 : i32
    return %c0_i32, %arg1 : i32, i32
  }
  func.func @transform_3(%arg0: i32, %arg1: i32) -> (i32, i32) {
    %c0_i32 = arith.constant 0 : i32
    return %arg0, %arg1 : i32, i32
  }
  func.func @transform_4(%arg0: i32, %arg1: i32) -> (i32, i32) {
    %c0_i32 = arith.constant 0 : i32
    return %arg0, %arg1 : i32, i32
  }
}

</mosaic_0001>

<bundles_post_ra>
// kernel: tpu_custom_call.1
= control target key start
LH: loop header
LB: loop body
LE: loop exit
PB: predicated region body
PF: predicated region fallthrough
CT: control target
= control target key end

     0   :  { %vm58_vm0 = vcmask 64512   ;;  %s3435_s0 = inlined_call_operand.vmem [shape: f32[256,8], index: 0, kind: input, shape index: {}]   ;;  %s3436_s1 = inlined_call_operand.vmem [shape: f32[8,128], index: 1, kind: input, shape index: {}]   ;;  %s3437_s2 = inlined_call_operand.vmem [shape: f32[1,128], index: 2, kind: input, shape index: {}]   ;;  %s3438_s3 = inlined_call_operand.vmem [shape: f32[256,128], index: 3, kind: input, shape index: {}]   ;;  %s3439_s4 = inlined_call_operand.hbm [shape: f32[256,128], index: 4, kind: output, shape index: {}]  }
   0x1   :  { %v50_v0 = vld [vmem:[%s3436_s1] sm:$0xff]  ;;  %v19_v2 = vld [vmem:[%s3435_s0 + $0x8] sm:$0xff]  ;;  %v20_v6 = vld [vmem:[%s3435_s0 + $0x10] sm:$0xff] }
   0x2   :  { %v18_v1 = vld [vmem:[%s3435_s0] sm:$0xff]  ;;  %v2801_v3 = vand.u32 4294901760, %v50_v0  ;;  %v63_v5 = vsel %vm58_vm0, %v19_v2, 0  ;;  %v21_v7 = vld [vmem:[%s3435_s0 + $0x18] sm:$0xff]  ;;  %v66_v11 = vsel %vm58_vm0, %v20_v6, 0  ;;  %v23_v13 = vld [vmem:[%s3435_s0 + $0x28] sm:$0xff] }
   0x3   :  { %v60_v4 = vsel %vm58_vm0, %v18_v1, 0  ;;  %v22_v8 = vld [vmem:[%s3435_s0 + $0x20] sm:$0xff]  ;;  %v2816_v10 = vand.u32 4294901760, %v63_v5  ;;  %v69_v12 = vsel %vm58_vm0, %v21_v7, 0  ;;  %v2828_v15 = vand.u32 4294901760, %v66_v11  ;;  %v24_v18 = vld [vmem:[%s3435_s0 + $0x30] sm:$0xff] }
   0x4   :  { %v2814_v9 = vand.u32 4294901760, %v60_v4  ;;  %2395 = vmatprep.subr.mxu0 %v2801_v3  ;;  %2245 = vmatprep.subr.mxu1 %v2801_v3  ;;  %v2826_v14 = vsub.f32 %v50_v0, %v2801_v3  ;;  %v2830_v16 = vand.u32 4294901760, %v69_v12  ;;  %v72_v17 = vsel %vm58_vm0, %v22_v8, 0  ;;  %v25_v39 = vld [vmem:[%s3435_s0 + $0x38] sm:$0xff]  ;;  %v26_v44 = vld [vmem:[%s3435_s0 + $0x40] sm:$0xff]  ;;  %v27_v49 = vld [vmem:[%s3435_s0 + $0x48] sm:$0xff] }
   0x5   :  { %2396 = vmatpush3.msra.mxu0 %v2801_v3  ;;  %v2841_v20 = vsub.f32 %v63_v5, %v2816_v10  ;;  %2246 = vmatpush3.msra.mxu1 %v2801_v3  ;;  %v2844_v21 = vand.u32 4294901760, %v72_v17  ;;  %v75_v22 = vsel %vm58_vm0, %v23_v13, 0  ;;  %v2849_v24 = vsub.f32 %v66_v11, %v2828_v15  ;;  %v28_v50 = vld [vmem:[%s3435_s0 + $0x50] sm:$0xff]  ;;  %v29_v55 = vld [vmem:[%s3435_s0 + $0x58] sm:$0xff] }
   0x6   :  { %v2838_v19 = vsub.f32 %v60_v4, %v2814_v9  ;;  %v544_v23 = vand.u32 4294901760, %v2826_v14  ;;  %v2852_v25 = vsub.f32 %v69_v12, %v2830_v16  ;;  %v2854_v26 = vand.u32 4294901760, %v75_v22 }
   0x7   :  { %v233_v28 = vand.u32 4294901760, %v2841_v20  ;;  %v2859_v29 = vsub.f32 %v72_v17, %v2844_v21  ;;  %v78_v30 = vsel %vm58_vm0, %v24_v18, 0  ;;  %v243_v32 = vand.u32 4294901760, %v2849_v24 }
   0x8   :  { %v223_v27 = vand.u32 4294901760, %v2838_v19  ;;  %v545_v31 = vsub.f32 %v2826_v14, %v544_v23  ;;  %v253_v33 = vand.u32 4294901760, %v2852_v25  ;;  %2445 = vmatprep.subr.mxu0 %v544_v23  ;;  %v2866_v34 = vsub.f32 %v75_v22, %v2854_v26 }
   0x9   :  { %v234_v36 = vsub.f32 %v2841_v20, %v233_v28  ;;  %v263_v37 = vand.u32 4294901760, %v2859_v29  ;;  %v2871_v38 = vand.u32 4294901760, %v78_v30  ;;  %v244_v41 = vsub.f32 %v2849_v24, %v243_v32 }
   0xa   :  { %2397 = vmatprep.mubr.f32.mxu0 %v223_v27  ;;  %v224_v35 = vsub.f32 %v2838_v19, %v223_v27  ;;  %v546_v40 = vand.u32 4294901760, %v545_v31  ;;  %v254_v42 = vsub.f32 %v2852_v25, %v253_v33  ;;  %v273_v43 = vand.u32 4294901760, %v2866_v34 }
   0xb   :  { %2398 = vmatmul.mubr.f32.vlgmr.msra.gmra.mrb[0].mxu0 %v233_v28  ;;  %v235_v46 = vand.u32 4294901760, %v234_v36  ;;  %v264_v47 = vsub.f32 %v2859_v29, %v263_v37  ;;  %v2884_v48 = vsub.f32 %v78_v30, %v2871_v38  ;;  %v245_v51 = vand.u32 4294901760, %v244_v41 }
   0xc   :  { %v225_v45 = vand.u32 4294901760, %v224_v35  ;;  %2400 = vmatprep.mubr.f32.mxu0 %v243_v32  ;;  %2446 = vmatpush3.msra.mxu0 %v544_v23  ;;  %v255_v52 = vand.u32 4294901760, %v254_v42  ;;  %v274_v53 = vsub.f32 %v2866_v34, %v273_v43  ;;  %v81_v54 = vsel %vm58_vm0, %v25_v39, 0 }
   0xd   :  { %2295 = vmatprep.subr.mxu1 %v546_v40  ;;  %2495 = vmatprep.subr.mxu0 %v2801_v3 }
   0xe   :  { %9 = vsyncpa [#allocation3], 0  ;;  %2247 = vmatprep.mubr.f32.mxu1 %v225_v45  ;;  %v265_v56 = vand.u32 4294901760, %v264_v47  ;;  %v283_v57 = vand.u32 4294901760, %v2884_v48  ;;  %v2899_v58 = vand.u32 4294901760, %v81_v54  ;;  %v84_v59 = vsel %vm58_vm0, %v26_v44, 0 }
   0xf   :  { %v30_v60 = vld [vmem:[%s3435_s0 + $0x60] sm:$0xff]  ;;  %v31_v61 = vld [vmem:[%s3435_s0 + $0x68] sm:$0xff]  ;;  %2248 = vmatmul.mubr.f32.vlgmr.msra.gmra.mrb[0].mxu1 %v235_v46  ;;  %2401 = vmatmul.mubr.f32.gmra.mrb[2].mxu0 %v253_v33  ;;  %v275_v62 = vand.u32 4294901760, %v274_v53  ;;  %v2908_v63 = vand.u32 4294901760, %v84_v59  ;;  %v87_v0 = vsel %vm58_vm0, %v27_v49, 0  ;;  %v90_v1 = vsel %vm58_vm0, %v28_v50, 0 }
  0x10   :  { %2296 = vmatpush3.msra.mxu1 %v546_v40  ;;  %2250 = vmatprep.mubr.f32.mxu1 %v245_v51  ;;  %v2913_v2 = vsub.f32 %v81_v54, %v2899_v58  ;;  %v284_v4 = vsub.f32 %v2884_v48, %v283_v57  ;;  %v2916_v5 = vand.u32 4294901760, %v87_v0  ;;  %v2918_v6 = vand.u32 4294901760, %v90_v1  ;;  %v32_v13 = vld [vmem:[%s3435_s0 + $0x70] sm:$0xff]  ;;  %v33_v42 = vld [vmem:[%s3435_s0 + $0x78] sm:$0xff]  ;;  %v34_v50 = vld [vmem:[%s3435_s0 + $0x80] sm:$0xff] }
  0x11   :  { %2403 = vmatprep.mubr.f32.mxu0 %v263_v37  ;;  %v2921_v7 = vsub.f32 %v84_v59, %v2908_v63  ;;  %v93_v8 = vsel %vm58_vm0, %v29_v55, 0  ;;  %v96_v11 = vsel %vm58_vm0, %v30_v60, 0  ;;  %v99_v12 = vsel %vm58_vm0, %v31_v61, 0  ;;  %2345 = vmatprep.subr.mxu1 %v2826_v14  ;;  %v35_v51 = vld [vmem:[%s3435_s0 + $0x88] sm:$0xff] }
  0x12   :  { %3458 = vst [vmem:[#allocation5_spill] sm:$0xff] %v2913_v2  ;;  %v293_v17 = vand.u32 4294901760, %v2913_v2  ;;  %v285_v18 = vand.u32 4294901760, %v284_v4  ;;  %v2932_v22 = vsub.f32 %v87_v0, %v2916_v5  ;;  %v2935_v23 = vsub.f32 %v90_v1, %v2918_v6  ;;  %v37_v0 = vld [vmem:[%s3435_s0 + $0x98] sm:$0xff]  ;;  %v38_v1 = vld [vmem:[%s3435_s0 + $0xa0] sm:$0xff] }
  0x13   :  { %3459 = vst [vmem:[#allocation6_spill] sm:$0xff] %v2921_v7  ;;  %2251 = vmatmul.mubr.f32.gmra.mrb[2].mxu1 %v255_v52  ;;  %2404 = vmatmul.mubr.f32.gmra.mrb[4].mxu0 %v273_v43  ;;  %v303_v27 = vand.u32 4294901760, %v2921_v7  ;;  %v2938_v28 = vand.u32 4294901760, %v93_v8  ;;  %v2940_v30 = vand.u32 4294901760, %v96_v11  ;;  %v2942_v31 = vand.u32 4294901760, %v99_v12  ;;  %v36_v52 = vld [vmem:[%s3435_s0 + $0x90] sm:$0xff] }
  0x14   :  { %3460 = vst [vmem:[#allocation7_spill] sm:$0xff] %v2932_v22  ;;  %3461 = vst [vmem:[#allocation8_spill] sm:$0xff] %v2935_v23  ;;  %2253 = vmatprep.mubr.f32.mxu1 %v265_v56  ;;  %2406 = vmatprep.mubr.f32.mxu0 %v283_v57  ;;  %v294_v32 = vsub.f32 %v2913_v2, %v293_v17  ;;  %v313_v33 = vand.u32 4294901760, %v2932_v22  ;;  %v323_v35 = vand.u32 4294901760, %v2935_v23  ;;  %v102_v36 = vsel %vm58_vm0, %v32_v13, 0 }
  0x15   :  { %v304_v37 = vsub.f32 %v2921_v7, %v303_v27  ;;  %v2950_v39 = vsub.f32 %v93_v8, %v2938_v28  ;;  %v2953_v40 = vsub.f32 %v96_v11, %v2940_v30  ;;  %v2956_v41 = vsub.f32 %v99_v12, %v2942_v31 }
  0x16   :  { %v295_v43 = vand.u32 4294901760, %v294_v32  ;;  %v2961_v44 = vand.u32 4294901760, %v102_v36  ;;  %v314_v45 = vsub.f32 %v2932_v22, %v313_v33  ;;  %v324_v47 = vsub.f32 %v2935_v23, %v323_v35  ;;  %v39_v32 = vld [vmem:[%s3435_s0 + $0xa8] sm:$0xff] }
  0x17   :  { %3462 = vst [vmem:[#allocation9_spill] sm:$0xff] %v2950_v39  ;;  %3463 = vst [vmem:[#allocation10_spill] sm:$0xff] %v2953_v40  ;;  %2254 = vmatmul.mubr.f32.gmra.mrb[4].mxu1 %v275_v62  ;;  %2407 = vmatmul.mubr.f32.gmra.mrb[6].mxu0 %v293_v17  ;;  %v333_v46 = vand.u32 4294901760, %v2950_v39  ;;  %v343_v49 = vand.u32 4294901760, %v2953_v40  ;;  %v305_v53 = vand.u32 4294901760, %v304_v37  ;;  %v105_v55 = vsel %vm58_vm0, %v33_v42, 0 }
  0x18   :  { %3464 = vst [vmem:[#allocation11_spill] sm:$0xff] %v2956_v41  ;;  %2256 = vmatprep.mubr.f32.mxu1 %v285_v18  ;;  %2409 = vmatprep.mubr.f32.mxu0 %v303_v27  ;;  %v2977_v54 = vsub.f32 %v102_v36, %v2961_v44  ;;  %v353_v56 = vand.u32 4294901760, %v2956_v41  ;;  %v2981_v57 = vand.u32 4294901760, %v105_v55  ;;  %v108_v60 = vsel %vm58_vm0, %v34_v50, 0 }
  0x19   :  { %v334_v59 = vsub.f32 %v2950_v39, %v333_v46  ;;  %v111_v61 = vsel %vm58_vm0, %v35_v51, 0  ;;  %v114_v62 = vsel %vm58_vm0, %v36_v52, 0  ;;  %v315_v4 = vand.u32 4294901760, %v314_v45 }
  0x1a   :  { %3465 = vst [vmem:[#allocation12_spill] sm:$0xff] %v2977_v54  ;;  %v325_v8 = vand.u32 4294901760, %v324_v47  ;;  %v344_v11 = vsub.f32 %v2953_v40, %v343_v49  ;;  %v2995_v12 = vsub.f32 %v105_v55, %v2981_v57  ;;  %v363_v13 = vand.u32 4294901760, %v2977_v54 }
  0x1b   :  { %2257 = vmatmul.mubr.f32.gmra.mrb[6].mxu1 %v295_v43  ;;  %2410 = vmatmul.mubr.f32.gmra.mrb[8].mxu0 %v313_v33  ;;  %v2998_v17 = vand.u32 4294901760, %v108_v60  ;;  %v3000_v18 = vand.u32 4294901760, %v111_v61  ;;  %v3002_v27 = vand.u32 4294901760, %v114_v62  ;;  %v117_v36 = vsel %vm58_vm0, %v37_v0, 0 }
  0x1c   :  { %3466 = vst [vmem:[#allocation13_spill] sm:$0xff] %v2995_v12  ;;  %2259 = vmatprep.mubr.f32.mxu1 %v305_v53  ;;  %2412 = vmatprep.mubr.f32.mxu0 %v323_v35  ;;  %v373_v33 = vand.u32 4294901760, %v2995_v12  ;;  %v120_v37 = vsel %vm58_vm0, %v38_v1, 0  ;;  %v40_v35 = vld [vmem:[%s3435_s0 + $0xb0] sm:$0xff]  ;;  %v335_v42 = vand.u32 4294901760, %v334_v59  ;;  %v354_v43 = vsub.f32 %v2956_v41, %v353_v56 }
  0x1d   :  { %v3015_v45 = vsub.f32 %v108_v60, %v2998_v17  ;;  %v3018_v47 = vsub.f32 %v111_v61, %v3000_v18  ;;  %v3021_v50 = vsub.f32 %v114_v62, %v3002_v27  ;;  %v3023_v51 = vand.u32 4294901760, %v117_v36 }
  0x1e   :  { %v3025_v52 = vand.u32 4294901760, %v120_v37  ;;  %v123_v53 = vsel %vm58_vm0, %v39_v32, 0  ;;  %v345_v55 = vand.u32 4294901760, %v344_v11  ;;  %v364_v59 = vsub.f32 %v2977_v54, %v363_v13 }
  0x1f   :  { %3467 = vst [vmem:[#allocation14_spill] sm:$0xff] %v3015_v45  ;;  %3468 = vst [vmem:[#allocation15_spill] sm:$0xff] %v3018_v47  ;;  %2260 = vmatmul.mubr.f32.gmra.mrb[8].mxu1 %v315_v4  ;;  %2413 = vmatmul.mubr.f32.gmra.mrb[10].mxu0 %v333_v46  ;;  %v383_v60 = vand.u32 4294901760, %v3015_v45  ;;  %v126_v61 = vsel %vm58_vm0, %v40_v35, 0  ;;  %v41_v46 = vld [vmem:[%s3435_s0 + $0xb8] sm:$0xff]  ;;  %v374_v62 = vsub.f32 %v2995_v12, %v373_v33  ;;  %v355_v0 = vand.u32 4294901760, %v354_v43 }
  0x20   :  { %3469 = vst [vmem:[#allocation16_spill] sm:$0xff] %v3021_v50  ;;  %2262 = vmatprep.mubr.f32.mxu1 %v325_v8  ;;  %2415 = vmatprep.mubr.f32.mxu0 %v343_v49  ;;  %v393_v1 = vand.u32 4294901760, %v3018_v47  ;;  %v3036_v4 = vand.u32 4294901760, %v123_v53  ;;  %v3038_v8 = vand.u32 4294901760, %v126_v61  ;;  %v403_v49 = vand.u32 4294901760, %v3021_v50  ;;  %v42_v43 = vld [vmem:[%s3435_s0 + $0xc0] sm:$0xff] }
  0x21   :  { %v3042_v11 = vsub.f32 %v117_v36, %v3023_v51  ;;  %v3045_v32 = vsub.f32 %v120_v37, %v3025_v52  ;;  %v129_v35 = vsel %vm58_vm0, %v41_v46, 0  ;;  %v365_v12 = vand.u32 4294901760, %v364_v59  ;;  %v43_v36 = vld [vmem:[%s3435_s0 + $0xc8] sm:$0xff]  ;;  %v44_v37 = vld [vmem:[%s3435_s0 + $0xd0] sm:$0xff] }
  0x22   :  { %v3059_v46 = vsub.f32 %v123_v53, %v3036_v4  ;;  %v3062_v54 = vsub.f32 %v126_v61, %v3038_v8  ;;  %v394_v59 = vsub.f32 %v3018_v47, %v393_v1  ;;  %v135_v61 = vsel %vm58_vm0, %v43_v36, 0 }
  0x23   :  { %2263 = vmatmul.mubr.f32.gmra.mrb[10].mxu1 %v335_v42  ;;  %2416 = vmatmul.mubr.f32.gmra.mrb[12].mxu0 %v353_v56  ;;  %3470 = vst [vmem:[#allocation17_spill] sm:$0xff] %v3042_v11  ;;  %3471 = vst [vmem:[#allocation18_spill] sm:$0xff] %v3045_v32  ;;  %v384_v42 = vsub.f32 %v3015_v45, %v383_v60  ;;  %v375_v56 = vand.u32 4294901760, %v374_v62  ;;  %v413_v62 = vand.u32 4294901760, %v3042_v11  ;;  %v423_v41 = vand.u32 4294901760, %v3045_v32 }
  0x24   :  { %2265 = vmatprep.mubr.f32.mxu1 %v345_v55  ;;  %2418 = vmatprep.mubr.f32.mxu0 %v363_v13  ;;  %3472 = vst [vmem:[#allocation19_spill] sm:$0xff] %v3059_v46  ;;  %3473 = vst [vmem:[#allocation20_spill] sm:$0xff] %v3062_v54  ;;  %v3064_v55 = vand.u32 4294901760, %v129_v35  ;;  %v132_v13 = vsel %vm58_vm0, %v42_v43, 0  ;;  %v404_v45 = vsub.f32 %v3021_v50, %v403_v49  ;;  %v138_v39 = vsel %vm58_vm0, %v44_v37, 0 }
  0x25   :  { %v385_v53 = vand.u32 4294901760, %v384_v42  ;;  %v3071_v40 = vand.u32 4294901760, %v132_v13  ;;  %v443_v43 = vand.u32 4294901760, %v3062_v54  ;;  %v414_v42 = vsub.f32 %v3042_v11, %v413_v62 }
  0x26   :  { %v3081_v50 = vsub.f32 %v129_v35, %v3064_v55  ;;  %v3087_v36 = vand.u32 4294901760, %v135_v61  ;;  %v3089_v37 = vand.u32 4294901760, %v138_v39  ;;  %v405_v47 = vand.u32 4294901760, %v404_v45  ;;  %v48_v45 = vld [vmem:[%s3435_s0 + $0xf0] sm:$0xff] }
  0x27   :  { %2266 = vmatmul.mubr.f32.gmra.mrb[12].mxu1 %v355_v0  ;;  %2419 = vmatmul.mubr.f32.gmra.mrb[14].mxu0 %v373_v33  ;;  %v45_v33 = vld [vmem:[%s3435_s0 + $0xd8] sm:$0xff]  ;;  %v433_v0 = vand.u32 4294901760, %v3059_v46  ;;  %v424_v23 = vsub.f32 %v3045_v32, %v423_v41  ;;  %v3093_v35 = vsub.f32 %v132_v13, %v3071_v40  ;;  %v415_v13 = vand.u32 4294901760, %v414_v42 }
  0x28   :  { %2268 = vmatprep.mubr.f32.mxu1 %v365_v12  ;;  %2421 = vmatprep.mubr.f32.mxu0 %v383_v60  ;;  %3474 = vst [vmem:[#allocation21_spill] sm:$0xff] %v3081_v50  ;;  %v46_v12 = vld [vmem:[%s3435_s0 + $0xe0] sm:$0xff]  ;;  %v395_v60 = vand.u32 4294901760, %v394_v59  ;;  %v141_v22 = vsel %vm58_vm0, %v45_v33, 0  ;;  %v453_v11 = vand.u32 4294901760, %v3081_v50  ;;  %v3110_v33 = vsub.f32 %v138_v39, %v3089_v37 }
  0x29   :  { %3475 = vst [vmem:[#allocation22_spill] sm:$0xff] %v3093_v35  ;;  %v434_v59 = vsub.f32 %v3059_v46, %v433_v0  ;;  %v425_v46 = vand.u32 4294901760, %v424_v23 }
  0x2a   :  { %v454_v42 = vsub.f32 %v3081_v50, %v453_v11 }
  0x2b   :  { %2269 = vmatmul.mubr.f32.gmra.mrb[14].mxu1 %v375_v56  ;;  %2422 = vmatmul.mubr.f32.gmra.mrb[16].mxu0 %v393_v1  ;;  %v144_v56 = vsel %vm58_vm0, %v46_v12, 0  ;;  %v47_v1 = vld [vmem:[%s3435_s0 + $0xe8] sm:$0xff]  ;;  %v3112_v12 = vand.u32 4294901760, %v141_v22 }
  0x2c   :  { %2271 = vmatprep.mubr.f32.mxu1 %v385_v53  ;;  %2424 = vmatprep.mubr.f32.mxu0 %v403_v49  ;;  %v444_v49 = vsub.f32 %v3062_v54, %v443_v43  ;;  %v3107_v53 = vsub.f32 %v135_v61, %v3087_v36  ;;  %v463_v54 = vand.u32 4294901760, %v3093_v35  ;;  %v3115_v32 = vand.u32 4294901760, %v144_v56  ;;  %v49_v61 = vld [vmem:[%s3435_s0 + $0xf8] sm:$0xff] }
  0x2d   :  { %v147_v7 = vsel %vm58_vm0, %v47_v1, 0 }
  0x2e   :  { %v445_v39 = vand.u32 4294901760, %v444_v49  ;;  %v473_v23 = vand.u32 4294901760, %v3107_v53  ;;  %v3128_v1 = vand.u32 4294901760, %v147_v7 }
  0x2f   :  { %2272 = vmatmul.mubr.f32.gmra.mrb[16].mxu1 %v395_v60  ;;  %2425 = vmatmul.mubr.f32.gmra.mrb[18].mxu0 %v413_v62  ;;  %v150_v62 = vsel %vm58_vm0, %v48_v45, 0  ;;  %v435_v60 = vand.u32 4294901760, %v434_v59  ;;  %v464_v45 = vsub.f32 %v3093_v35, %v463_v54  ;;  %v3132_v59 = vsub.f32 %v144_v56, %v3115_v32 }
  0x30   :  { %2274 = vmatprep.mubr.f32.mxu1 %v405_v47  ;;  %2427 = vmatprep.mubr.f32.mxu0 %v423_v41  ;;  %v483_v41 = vand.u32 4294901760, %v3110_v33  ;;  %v3126_v47 = vsub.f32 %v141_v22, %v3112_v12  ;;  %v3134_v49 = vand.u32 4294901760, %v150_v62  ;;  %v474_v50 = vsub.f32 %v3107_v53, %v473_v23 }
  0x31   :  { %v3140_v2 = vsub.f32 %v147_v7, %v3128_v1  ;;  %v503_v35 = vand.u32 4294901760, %v3132_v59 }
  0x32   :  { %v493_v22 = vand.u32 4294901760, %v3126_v47  ;;  %v484_v56 = vsub.f32 %v3110_v33, %v483_v41 }
  0x33   :  { %2275 = vmatmul.mubr.f32.gmra.mrb[18].mxu1 %v415_v13  ;;  %2428 = vmatmul.mubr.f32.gmra.mrb[20].mxu0 %v433_v0  ;;  %v153_v0 = vsel %vm58_vm0, %v49_v61, 0  ;;  %v455_v13 = vand.u32 4294901760, %v454_v42  ;;  %v3147_v61 = vsub.f32 %v150_v62, %v3134_v49  ;;  %v513_v7 = vand.u32 4294901760, %v3140_v2 }
  0x34   :  { %2277 = vmatprep.mubr.f32.mxu1 %v425_v46  ;;  %2430 = vmatprep.mubr.f32.mxu0 %v443_v43  ;;  %v3142_v46 = vand.u32 4294901760, %v153_v0  ;;  %v465_v43 = vand.u32 4294901760, %v464_v45 }
  0x35   :  { %v523_v45 = vand.u32 4294901760, %v3147_v61 }
  0x36   :  { %v3152_v42 = vsub.f32 %v153_v0, %v3142_v46 }
  0x37   :  { %2278 = vmatmul.mubr.f32.gmra.mrb[20].mxu1 %v435_v60  ;;  %2431 = vmatmul.mubr.f32.gmra.mrb[22].mxu0 %v453_v11  ;;  %v475_v11 = vand.u32 4294901760, %v474_v50  ;;  %v494_v60 = vsub.f32 %v3126_v47, %v493_v22  ;;  %v524_v0 = vsub.f32 %v3147_v61, %v523_v45 }
  0x38   :  { %2280 = vmatprep.mubr.f32.mxu1 %v445_v39  ;;  %2433 = vmatprep.mubr.f32.mxu0 %v463_v54  ;;  %v485_v54 = vand.u32 4294901760, %v484_v56  ;;  %v504_v39 = vsub.f32 %v3132_v59, %v503_v35  ;;  %v533_v50 = vand.u32 4294901760, %v3152_v42 }
  0x39   :  { %v495_v62 = vand.u32 4294901760, %v494_v60  ;;  %v525_v56 = vand.u32 4294901760, %v524_v0 }
  0x3b   :  { %2281 = vmatmul.mubr.f32.gmra.mrb[22].mxu1 %v455_v13  ;;  %2434 = vmatmul.mubr.f32.gmra.mrb[24].mxu0 %v473_v23  ;;  %v514_v23 = vsub.f32 %v3140_v2, %v513_v7  ;;  %v505_v13 = vand.u32 4294901760, %v504_v39  ;;  %v1938_v39 = vld [vmem:[%s3438_s3 + $0x20] sm:$0xff] }
  0x3c   :  { %2283 = vmatprep.mubr.f32.mxu1 %v465_v43  ;;  %2436 = vmatprep.mubr.f32.mxu0 %v483_v41  ;;  %v534_v43 = vsub.f32 %v3152_v42, %v533_v50 }
  0x3d   :  { %v515_v41 = vand.u32 4294901760, %v514_v23 }
  0x3f   :  { %2284 = vmatmul.mubr.f32.gmra.mrb[24].mxu1 %v475_v11  ;;  %2437 = vmatmul.mubr.f32.gmra.mrb[26].mxu0 %v493_v22  ;;  %v535_v22 = vand.u32 4294901760, %v534_v43 }
  0x40   :  { %2286 = vmatprep.mubr.f32.mxu1 %v485_v54  ;;  %2439 = vmatprep.mubr.f32.mxu0 %v503_v35  ;;  %v1937_v35 = vld [vmem:[%s3438_s3 + $0x18] sm:$0xff] }
  0x43   :  { %2287 = vmatmul.mubr.f32.gmra.mrb[26].mxu1 %v495_v62  ;;  %2440 = vmatmul.mubr.f32.gmra.mrb[28].mxu0 %v513_v7  ;;  %v1939_v7 = vld [vmem:[%s3438_s3 + $0x28] sm:$0xff] }
  0x44   :  { %2289 = vmatprep.mubr.f32.mxu1 %v505_v13  ;;  %2442 = vmatprep.mubr.f32.mxu0 %v523_v45 }
  0x47   :  { %2290 = vmatmul.mubr.f32.gmra.mrb[28].mxu1 %v515_v41  ;;  %2443 = vmatmul.mubr.f32.gmra.mrb[30].mxu0 %v533_v50 }
  0x48   :  { %2292 = vmatprep.mubr.f32.mxu1 %v525_v56  ;;  %2447 = vmatprep.mubr.f32.mxu0 %v2814_v9  ;;  %v1941_v56 = vld [vmem:[%s3438_s3 + $0x38] sm:$0xff] }
  0x4b   :  { %2293 = vmatmul.mubr.f32.gmra.mrb[30].mxu1 %v535_v22  ;;  %2448 = vmatmul.mubr.f32.vlgmr.msra.gmra.mrb[0].mxu0 %v2816_v10 }
  0x4c   :  { %2297 = vmatprep.mubr.f32.mxu1 %v2814_v9  ;;  %2450 = vmatprep.mubr.f32.mxu0 %v2828_v15 }
  0x4d   :  { %2496 = vmatpush3.msra.mxu0 %v2801_v3  ;;  %v3476_v3 = vld [vmem:[#allocation5_spill] sm:$0xff] }
  0x4f   :  { %2298 = vmatmul.mubr.f32.vlgmr.msra.gmra.mrb[0].mxu1 %v2816_v10  ;;  %2451 = vmatmul.mubr.f32.gmra.mrb[2].mxu0 %v2830_v16 }
  0x50   :  { %2346 = vmatpush3.msra.mxu1 %v2826_v14  ;;  %2300 = vmatprep.mubr.f32.mxu1 %v2828_v15  ;;  %v3479_v14 = vld [vmem:[#allocation8_spill] sm:$0xff] }
  0x51   :  { %2453 = vmatprep.mubr.f32.mxu0 %v2844_v21 }
  0x53   :  { %2301 = vmatmul.mubr.f32.gmra.mrb[2].mxu1 %v2830_v16  ;;  %2454 = vmatmul.mubr.f32.gmra.mrb[4].mxu0 %v2854_v26 }
  0x54   :  { %2303 = vmatprep.mubr.f32.mxu1 %v2844_v21  ;;  %2456 = vmatprep.mubr.f32.mxu0 %v2871_v38 }
  0x57   :  { %2304 = vmatmul.mubr.f32.gmra.mrb[4].mxu1 %v2854_v26  ;;  %2457 = vmatmul.mubr.f32.gmra.mrb[6].mxu0 %v2899_v58 }
  0x58   :  { %2306 = vmatprep.mubr.f32.mxu1 %v2871_v38  ;;  %2459 = vmatprep.mubr.f32.mxu0 %v2908_v63 }
  0x5b   :  { %2307 = vmatmul.mubr.f32.gmra.mrb[6].mxu1 %v2899_v58  ;;  %2460 = vmatmul.mubr.f32.gmra.mrb[8].mxu0 %v2916_v5 }
  0x5c   :  { %2309 = vmatprep.mubr.f32.mxu1 %v2908_v63  ;;  %2462 = vmatprep.mubr.f32.mxu0 %v2918_v6 }
  0x5f   :  { %2310 = vmatmul.mubr.f32.gmra.mrb[8].mxu1 %v2916_v5  ;;  %2463 = vmatmul.mubr.f32.gmra.mrb[10].mxu0 %v2938_v28 }
  0x60   :  { %2312 = vmatprep.mubr.f32.mxu1 %v2918_v6  ;;  %2465 = vmatprep.mubr.f32.mxu0 %v2940_v30 }
  0x63   :  { %2313 = vmatmul.mubr.f32.gmra.mrb[10].mxu1 %v2938_v28  ;;  %2466 = vmatmul.mubr.f32.gmra.mrb[12].mxu0 %v2942_v31 }
  0x64   :  { %2315 = vmatprep.mubr.f32.mxu1 %v2940_v30  ;;  %2468 = vmatprep.mubr.f32.mxu0 %v2961_v44 }
  0x67   :  { %2316 = vmatmul.mubr.f32.gmra.mrb[12].mxu1 %v2942_v31  ;;  %2469 = vmatmul.mubr.f32.gmra.mrb[14].mxu0 %v2981_v57 }
  0x68   :  { %2318 = vmatprep.mubr.f32.mxu1 %v2961_v44  ;;  %2471 = vmatprep.mubr.f32.mxu0 %v2998_v17 }
  0x6b   :  { %2319 = vmatmul.mubr.f32.gmra.mrb[14].mxu1 %v2981_v57  ;;  %2472 = vmatmul.mubr.f32.gmra.mrb[16].mxu0 %v3000_v18 }
  0x6c   :  { %2321 = vmatprep.mubr.f32.mxu1 %v2998_v17  ;;  %2474 = vmatprep.mubr.f32.mxu0 %v3002_v27 }
  0x6f   :  { %2322 = vmatmul.mubr.f32.gmra.mrb[16].mxu1 %v3000_v18  ;;  %2475 = vmatmul.mubr.f32.gmra.mrb[18].mxu0 %v3023_v51 }
  0x70   :  { %2324 = vmatprep.mubr.f32.mxu1 %v3002_v27  ;;  %2477 = vmatprep.mubr.f32.mxu0 %v3025_v52 }
  0x73   :  { %2325 = vmatmul.mubr.f32.gmra.mrb[18].mxu1 %v3023_v51  ;;  %2478 = vmatmul.mubr.f32.gmra.mrb[20].mxu0 %v3036_v4 }
  0x74   :  { %2327 = vmatprep.mubr.f32.mxu1 %v3025_v52  ;;  %2480 = vmatprep.mubr.f32.mxu0 %v3038_v8 }
  0x77   :  { %2328 = vmatmul.mubr.f32.gmra.mrb[20].mxu1 %v3036_v4  ;;  %2481 = vmatmul.mubr.f32.gmra.mrb[22].mxu0 %v3064_v55 }
  0x78   :  { %2330 = vmatprep.mubr.f32.mxu1 %v3038_v8  ;;  %2483 = vmatprep.mubr.f32.mxu0 %v3071_v40 }
  0x7b   :  { %2331 = vmatmul.mubr.f32.gmra.mrb[22].mxu1 %v3064_v55  ;;  %2484 = vmatmul.mubr.f32.gmra.mrb[24].mxu0 %v3087_v36 }
  0x7c   :  { %2333 = vmatprep.mubr.f32.mxu1 %v3071_v40  ;;  %2486 = vmatprep.mubr.f32.mxu0 %v3089_v37 }
  0x7f   :  { %2334 = vmatmul.mubr.f32.gmra.mrb[24].mxu1 %v3087_v36  ;;  %2487 = vmatmul.mubr.f32.gmra.mrb[26].mxu0 %v3112_v12 }
  0x80   :  { %2336 = vmatprep.mubr.f32.mxu1 %v3089_v37  ;;  %2489 = vmatprep.mubr.f32.mxu0 %v3115_v32 }
  0x83   :  { %2337 = vmatmul.mubr.f32.gmra.mrb[26].mxu1 %v3112_v12  ;;  %2490 = vmatmul.mubr.f32.gmra.mrb[28].mxu0 %v3128_v1 }
  0x84   :  { %2339 = vmatprep.mubr.f32.mxu1 %v3115_v32  ;;  %2492 = vmatprep.mubr.f32.mxu0 %v3134_v49 }
  0x87   :  { %2340 = vmatmul.mubr.f32.gmra.mrb[28].mxu1 %v3128_v1  ;;  %2493 = vmatmul.mubr.f32.gmra.mrb[30].mxu0 %v3142_v46 }
  0x88   :  { %2342 = vmatprep.mubr.f32.mxu1 %v3134_v49  ;;  %2497 = vmatprep.mubr.f32.mxu0 %v2814_v9  ;;  %v3477_v9 = vld [vmem:[#allocation6_spill] sm:$0xff] }
  0x8b   :  { %2343 = vmatmul.mubr.f32.gmra.mrb[30].mxu1 %v3142_v46  ;;  %2498 = vmatmul.mubr.f32.vlgmr.msra.gmra.mrb[0].mxu0 %v2816_v10  ;;  %v3478_v10 = vld [vmem:[#allocation7_spill] sm:$0xff] }
  0x8c   :  { %2347 = vmatprep.mubr.f32.mxu1 %v2838_v19  ;;  %2500 = vmatprep.mubr.f32.mxu0 %v2828_v15  ;;  %v3480_v15 = vld [vmem:[#allocation9_spill] sm:$0xff]  ;;  %v3482_v19 = vld [vmem:[#allocation11_spill] sm:$0xff] }
  0x8f   :  { %2348 = vmatmul.mubr.f32.vlgmr.msra.gmra.mrb[0].mxu1 %v2841_v20  ;;  %2501 = vmatmul.mubr.f32.gmra.mrb[2].mxu0 %v2830_v16  ;;  %v3481_v16 = vld [vmem:[#allocation10_spill] sm:$0xff]  ;;  %v3483_v20 = vld [vmem:[#allocation12_spill] sm:$0xff] }
  0x90   :  { %2350 = vmatprep.mubr.f32.mxu1 %v2849_v24  ;;  %2503 = vmatprep.mubr.f32.mxu0 %v2844_v21  ;;  %v3484_v21 = vld [vmem:[#allocation13_spill] sm:$0xff]  ;;  %v3485_v24 = vld [vmem:[#allocation14_spill] sm:$0xff] }
  0x93   :  { %2351 = vmatmul.mubr.f32.gmra.mrb[2].mxu1 %v2852_v25  ;;  %2504 = vmatmul.mubr.f32.gmra.mrb[4].mxu0 %v2854_v26  ;;  %v3486_v25 = vld [vmem:[#allocation15_spill] sm:$0xff]  ;;  %v3487_v26 = vld [vmem:[#allocation16_spill] sm:$0xff] }
  0x94   :  { %2353 = vmatprep.mubr.f32.mxu1 %v2859_v29  ;;  %2506 = vmatprep.mubr.f32.mxu0 %v2871_v38  ;;  %v3488_v29 = vld [vmem:[#allocation17_spill] sm:$0xff]  ;;  %v3490_v38 = vld [vmem:[#allocation19_spill] sm:$0xff] }
  0x97   :  { %2354 = vmatmul.mubr.f32.gmra.mrb[4].mxu1 %v2866_v34  ;;  %2507 = vmatmul.mubr.f32.gmra.mrb[6].mxu0 %v2899_v58  ;;  %v3489_v34 = vld [vmem:[#allocation18_spill] sm:$0xff]  ;;  %v3492_v58 = vld [vmem:[#allocation21_spill] sm:$0xff] }
  0x98   :  { %2356 = vmatprep.mubr.f32.mxu1 %v2884_v48  ;;  %2509 = vmatprep.mubr.f32.mxu0 %v2908_v63  ;;  %v3491_v48 = vld [vmem:[#allocation20_spill] sm:$0xff]  ;;  %v3493_v63 = vld [vmem:[#allocation22_spill] sm:$0xff] }
  0x9b   :  { %2357 = vmatmul.mubr.f32.gmra.mrb[6].mxu1 %v3476_v3  ;;  %2510 = vmatmul.mubr.f32.gmra.mrb[8].mxu0 %v2916_v5 }
  0x9c   :  { %2359 = vmatprep.mubr.f32.mxu1 %v3477_v9  ;;  %2512 = vmatprep.mubr.f32.mxu0 %v2918_v6  ;;  %v1940_v9 = vld [vmem:[%s3438_s3 + $0x30] sm:$0xff] }
  0x9f   :  { %2360 = vmatmul.mubr.f32.gmra.mrb[8].mxu1 %v3478_v10  ;;  %2513 = vmatmul.mubr.f32.gmra.mrb[10].mxu0 %v2938_v28  ;;  %v3293_v28 = vld [vmem:[%s3437_s2] ss:$0 sm:$0xff]  ;;  %s2764_s2 = smov [#allocation2]  }
  0xa0   :  { %2362 = vmatprep.mubr.f32.mxu1 %v3479_v14  ;;  %2515 = vmatprep.mubr.f32.mxu0 %v2940_v30  ;;  %s2035_s5 = sshll.u32 %s2764_s2, 4  ;;  %s2036_s5 = int_to_ptr.vmem [resolvable:$true] %s2035_s5 }
  0xa1   :  { %s2740_s8 = scalar_lea.vmem %s2036_s5, 4096  ;;  %p2745_p1 = scmp.lt.s32.totalorder %s2036_s5, %s2036_s5 }
  0xa2   :  { %p2741_p0 = scmp.ne.s32.totalorder %s2036_s5, %s2740_s8  ;;  %p2746_p2 = scmp.lt.s32.totalorder %s2740_s8, %s2740_s8 }
  0xa3   :  { %2363 = vmatmul.mubr.f32.gmra.mrb[10].mxu1 %v3480_v15  ;;  %2516 = vmatmul.mubr.f32.gmra.mrb[12].mxu0 %v2942_v31 }
  0xa4   :  { %2365 = vmatprep.mubr.f32.mxu1 %v3481_v16  ;;  %2518 = vmatprep.mubr.f32.mxu0 %v2961_v44  ;;  %p2747_p3 = por %p2746_p2, %p2745_p1 }
  0xa6   :  { %p2748_p4 = pnand %p2747_p3, %p2741_p0 }
  0xa7   :  { %2366 = vmatmul.mubr.f32.gmra.mrb[12].mxu1 %v3482_v19  ;;  %2519 = vmatmul.mubr.f32.gmra.mrb[14].mxu0 %v2981_v57 }
  0xa8   :  { %2368 = vmatprep.mubr.f32.mxu1 %v3483_v20  ;;  %2521 = vmatprep.mubr.f32.mxu0 %v2998_v17 }
  0xab   :  { %2369 = vmatmul.mubr.f32.gmra.mrb[14].mxu1 %v3484_v21  ;;  %2522 = vmatmul.mubr.f32.gmra.mrb[16].mxu0 %v3000_v18 }
  0xac   :  { %2371 = vmatprep.mubr.f32.mxu1 %v3485_v24  ;;  %2524 = vmatprep.mubr.f32.mxu0 %v3002_v27  ;;  %v1934_v27 = vld [vmem:[%s3438_s3] sm:$0xff] }
  0xaf   :  { %2372 = vmatmul.mubr.f32.gmra.mrb[16].mxu1 %v3486_v25  ;;  %2525 = vmatmul.mubr.f32.gmra.mrb[18].mxu0 %v3023_v51  ;;  %v1943_v25 = vld [vmem:[%s3438_s3 + $0x48] sm:$0xff] }
  0xb0   :  { %2374 = vmatprep.mubr.f32.mxu1 %v3487_v26  ;;  %2527 = vmatprep.mubr.f32.mxu0 %v3025_v52 }
  0xb3   :  { %2375 = vmatmul.mubr.f32.gmra.mrb[18].mxu1 %v3488_v29  ;;  %2528 = vmatmul.mubr.f32.gmra.mrb[20].mxu0 %v3036_v4 }
  0xb4   :  { %2377 = vmatprep.mubr.f32.mxu1 %v3489_v34  ;;  %2530 = vmatprep.mubr.f32.mxu0 %v3038_v8  ;;  %v1942_v34 = vld [vmem:[%s3438_s3 + $0x40] sm:$0xff] }
  0xb7   :  { %2378 = vmatmul.mubr.f32.gmra.mrb[20].mxu1 %v3490_v38  ;;  %2531 = vmatmul.mubr.f32.gmra.mrb[22].mxu0 %v3064_v55 }
  0xb8   :  { %2380 = vmatprep.mubr.f32.mxu1 %v3491_v48  ;;  %2533 = vmatprep.mubr.f32.mxu0 %v3071_v40 }
  0xbb   :  { %2381 = vmatmul.mubr.f32.gmra.mrb[22].mxu1 %v3492_v58  ;;  %2534 = vmatmul.mubr.f32.gmra.mrb[24].mxu0 %v3087_v36 }
  0xbc   :  { %2383 = vmatprep.mubr.f32.mxu1 %v3493_v63  ;;  %2536 = vmatprep.mubr.f32.mxu0 %v3089_v37 }
  0xbf   :  { %2384 = vmatmul.mubr.f32.gmra.mrb[24].mxu1 %v3107_v53  ;;  %2537 = vmatmul.mubr.f32.gmra.mrb[26].mxu0 %v3112_v12  ;;  %v1936_v12 = vld [vmem:[%s3438_s3 + $0x10] sm:$0xff] }
  0xc0   :  { %2386 = vmatprep.mubr.f32.mxu1 %v3110_v33  ;;  %2539 = vmatprep.mubr.f32.mxu0 %v3115_v32 }
  0xc3   :  { %2387 = vmatmul.mubr.f32.gmra.mrb[26].mxu1 %v3126_v47  ;;  %2540 = vmatmul.mubr.f32.gmra.mrb[28].mxu0 %v3128_v1 }
  0xc4   :  { %2389 = vmatprep.mubr.f32.mxu1 %v3132_v59  ;;  %2542 = vmatprep.mubr.f32.mxu0 %v3134_v49 }
  0xc7   :  { %2390 = vmatmul.mubr.f32.gmra.mrb[28].mxu1 %v3140_v2  ;;  %2543 = vmatmul.mubr.f32.gmra.mrb[30].mxu0 %v3142_v46  ;;  %v1935_v2 = vld [vmem:[%s3438_s3 + $0x8] sm:$0xff] }
  0xc8   :  { %2392 = vmatprep.mubr.f32.mxu1 %v3147_v61 }
  0xcb   :  { %2393 = vmatmul.mubr.f32.gmra.mrb[30].mxu1 %v3152_v42 }
 0x15e   :  { %v2499_v5 = vpop.f32.mrb[0].mxu0 }
 0x15f   :  { %v1744_v6 = vpop.f32.mrb[1].mxu0 }
 0x162   :  { %v2349_v30 = vpop.f32.mrb[0].mxu1  ;;  %v2502_v31 = vpop.f32.mrb[2].mxu0 }
 0x163   :  { %v2545_v40 = vadd.f32 %v2349_v30, %v3293_v28  ;;  %v873_v44 = vpop.f32.mrb[1].mxu1  ;;  %v1756_v57 = vpop.f32.mrb[3].mxu0 }
 0x164   :  { %v2547_v17 = vadd.f32 %v3293_v28, %v873_v44 }
 0x165   :  { %v2546_v18 = vadd.f32 %v2545_v40, %v2499_v5  ;;  %v1945_v40 = vld [vmem:[%s3438_s3 + $0x58] sm:$0xff] }
 0x166   :  { %v2548_v51 = vadd.f32 %v2547_v17, %v1744_v6  ;;  %v2352_v52 = vpop.f32.mrb[2].mxu1  ;;  %v2505_v4 = vpop.f32.mrb[4].mxu0 }
 0x167   :  { %v1967_v8 = vmul.f32 %v2546_v18, %v1935_v2  ;;  %v2549_v32 = vadd.f32 %v2352_v52, %v3293_v28  ;;  %v887_v55 = vpop.f32.mrb[3].mxu1  ;;  %v1768_v36 = vpop.f32.mrb[5].mxu0  ;;  %v1944_v2 = vld [vmem:[%s3438_s3 + $0x50] sm:$0xff] }
 0x168   :  { %v1966_v37 = vmul.f32 %v2548_v51, %v1934_v27  ;;  %v2551_v53 = vadd.f32 %v3293_v28, %v887_v55  ;;  %v1947_v55 = vld [vmem:[%s3438_s3 + $0x68] sm:$0xff] }
 0x169   :  { %1999 = vst [vmem:[#allocation2 + $0x8] sm:$0xff] %v1967_v8  ;;  %v2550_v33 = vadd.f32 %v2549_v32, %v2502_v31 }
 0x16a   :  { %1998 = vst [vmem:[#allocation2] sm:$0xff] %v1966_v37  ;;  %v2552_v47 = vadd.f32 %v2551_v53, %v1756_v57  ;;  %v2355_v1 = vpop.f32.mrb[4].mxu1  ;;  %v2508_v59 = vpop.f32.mrb[6].mxu0 }
 0x16b   :  { %v1969_v49 = vmul.f32 %v2550_v33, %v1937_v35  ;;  %v2553_v46 = vadd.f32 %v2355_v1, %v3293_v28  ;;  %v901_v61 = vpop.f32.mrb[5].mxu1  ;;  %v1780_v11 = vpop.f32.mrb[7].mxu0  ;;  %v1946_v35 = vld [vmem:[%s3438_s3 + $0x60] sm:$0xff] }
 0x16c   :  { %v1968_v60 = vmul.f32 %v2552_v47, %v1936_v12  ;;  %v2555_v42 = vadd.f32 %v3293_v28, %v901_v61  ;;  %v1949_v61 = vld [vmem:[%s3438_s3 + $0x78] sm:$0xff] }
 0x16d   :  { %2001 = vst [vmem:[#allocation2 + $0x18] sm:$0xff] %v1969_v49  ;;  %v2554_v54 = vadd.f32 %v2553_v46, %v2505_v4 }
 0x16e   :  { %2000 = vst [vmem:[#allocation2 + $0x10] sm:$0xff] %v1968_v60  ;;  %v2556_v45 = vadd.f32 %v2555_v42, %v1768_v36  ;;  %v2358_v62 = vpop.f32.mrb[6].mxu1  ;;  %v2511_v23 = vpop.f32.mrb[8].mxu0 }
 0x16f   :  { %v1971_v50 = vmul.f32 %v2554_v54, %v1939_v7  ;;  %v2557_v13 = vadd.f32 %v2358_v62, %v3293_v28  ;;  %v915_v0 = vpop.f32.mrb[7].mxu1  ;;  %v1792_v41 = vpop.f32.mrb[9].mxu0  ;;  %v1948_v7 = vld [vmem:[%s3438_s3 + $0x70] sm:$0xff] }
 0x170   :  { %v1970_v43 = vmul.f32 %v2556_v45, %v1938_v39  ;;  %v2559_v22 = vadd.f32 %v3293_v28, %v915_v0  ;;  %v1951_v0 = vld [vmem:[%s3438_s3 + $0x88] sm:$0xff] }
 0x171   :  { %2003 = vst [vmem:[#allocation2 + $0x28] sm:$0xff] %v1971_v50  ;;  %v2558_v3 = vadd.f32 %v2557_v13, %v2508_v59 }
 0x172   :  { %2002 = vst [vmem:[#allocation2 + $0x20] sm:$0xff] %v1970_v43  ;;  %v2560_v10 = vadd.f32 %v2559_v22, %v1780_v11  ;;  %v2361_v14 = vpop.f32.mrb[8].mxu1  ;;  %v2514_v15 = vpop.f32.mrb[10].mxu0 }
 0x173   :  { %v1973_v16 = vmul.f32 %v2558_v3, %v1941_v56  ;;  %v2561_v19 = vadd.f32 %v2361_v14, %v3293_v28  ;;  %v929_v20 = vpop.f32.mrb[9].mxu1  ;;  %v1804_v21 = vpop.f32.mrb[11].mxu0  ;;  %v1950_v56 = vld [vmem:[%s3438_s3 + $0x80] sm:$0xff] }
 0x174   :  { %v1972_v24 = vmul.f32 %v2560_v10, %v1940_v9  ;;  %v2563_v26 = vadd.f32 %v3293_v28, %v929_v20  ;;  %v1953_v20 = vld [vmem:[%s3438_s3 + $0x98] sm:$0xff] }
 0x175   :  { %2005 = vst [vmem:[#allocation2 + $0x38] sm:$0xff] %v1973_v16  ;;  %v2562_v29 = vadd.f32 %v2561_v19, %v2511_v23 }
 0x176   :  { %2004 = vst [vmem:[#allocation2 + $0x30] sm:$0xff] %v1972_v24  ;;  %v2564_v38 = vadd.f32 %v2563_v26, %v1792_v41  ;;  %v2364_v48 = vpop.f32.mrb[10].mxu1  ;;  %v2517_v58 = vpop.f32.mrb[12].mxu0 }
 0x177   :  { %v1975_v63 = vmul.f32 %v2562_v29, %v1943_v25  ;;  %v2565_v5 = vadd.f32 %v2364_v48, %v3293_v28  ;;  %v943_v6 = vpop.f32.mrb[11].mxu1  ;;  %v1816_v30 = vpop.f32.mrb[13].mxu0  ;;  %v1952_v25 = vld [vmem:[%s3438_s3 + $0x90] sm:$0xff] }
 0x178   :  { %v1974_v31 = vmul.f32 %v2564_v38, %v1942_v34  ;;  %v2567_v44 = vadd.f32 %v3293_v28, %v943_v6  ;;  %v1955_v6 = vld [vmem:[%s3438_s3 + $0xa8] sm:$0xff] }
 0x179   :  { %2007 = vst [vmem:[#allocation2 + $0x48] sm:$0xff] %v1975_v63  ;;  %v2566_v57 = vadd.f32 %v2565_v5, %v2514_v15 }
 0x17a   :  { %2006 = vst [vmem:[#allocation2 + $0x40] sm:$0xff] %v1974_v31  ;;  %v2568_v17 = vadd.f32 %v2567_v44, %v1804_v21  ;;  %v2367_v18 = vpop.f32.mrb[12].mxu1  ;;  %v2520_v27 = vpop.f32.mrb[14].mxu0 }
 0x17b   :  { %v1977_v51 = vmul.f32 %v2566_v57, %v1945_v40  ;;  %v2569_v52 = vadd.f32 %v2367_v18, %v3293_v28  ;;  %v957_v4 = vpop.f32.mrb[13].mxu1  ;;  %v1828_v8 = vpop.f32.mrb[15].mxu0  ;;  %v1954_v40 = vld [vmem:[%s3438_s3 + $0xa0] sm:$0xff] }
 0x17c   :  { %v1976_v32 = vmul.f32 %v2568_v17, %v1944_v2  ;;  %v2571_v36 = vadd.f32 %v3293_v28, %v957_v4  ;;  %v1957_v4 = vld [vmem:[%s3438_s3 + $0xb8] sm:$0xff] }
 0x17d   :  { %2009 = vst [vmem:[#allocation2 + $0x58] sm:$0xff] %v1977_v51  ;;  %v2570_v37 = vadd.f32 %v2569_v52, %v2517_v58 }
 0x17e   :  { %2008 = vst [vmem:[#allocation2 + $0x50] sm:$0xff] %v1976_v32  ;;  %v2572_v53 = vadd.f32 %v2571_v36, %v1816_v30  ;;  %v2370_v33 = vpop.f32.mrb[14].mxu1  ;;  %v2523_v12 = vpop.f32.mrb[16].mxu0 }
 0x17f   :  { %v1979_v47 = vmul.f32 %v2570_v37, %v1947_v55  ;;  %v2573_v1 = vadd.f32 %v2370_v33, %v3293_v28  ;;  %v971_v59 = vpop.f32.mrb[15].mxu1  ;;  %v1840_v49 = vpop.f32.mrb[17].mxu0  ;;  %v1956_v55 = vld [vmem:[%s3438_s3 + $0xb0] sm:$0xff] }
 0x180   :  { %v1978_v46 = vmul.f32 %v2572_v53, %v1946_v35  ;;  %v2575_v11 = vadd.f32 %v3293_v28, %v971_v59  ;;  %v1959_v59 = vld [vmem:[%s3438_s3 + $0xc8] sm:$0xff] }
 0x181   :  { %2011 = vst [vmem:[#allocation2 + $0x68] sm:$0xff] %v1979_v47  ;;  %v2574_v60 = vadd.f32 %v2573_v1, %v2520_v27 }
 0x182   :  { %2010 = vst [vmem:[#allocation2 + $0x60] sm:$0xff] %v1978_v46  ;;  %v2576_v42 = vadd.f32 %v2575_v11, %v1828_v8  ;;  %v2373_v54 = vpop.f32.mrb[16].mxu1  ;;  %v2526_v39 = vpop.f32.mrb[18].mxu0 }
 0x183   :  { %v1981_v45 = vmul.f32 %v2574_v60, %v1949_v61  ;;  %v2577_v62 = vadd.f32 %v2373_v54, %v3293_v28  ;;  %v985_v23 = vpop.f32.mrb[17].mxu1  ;;  %v1852_v50 = vpop.f32.mrb[19].mxu0  ;;  %v1958_v61 = vld [vmem:[%s3438_s3 + $0xc0] sm:$0xff] }
 0x184   :  { %v1980_v13 = vmul.f32 %v2576_v42, %v1948_v7  ;;  %v2579_v41 = vadd.f32 %v3293_v28, %v985_v23  ;;  %v1961_v23 = vld [vmem:[%s3438_s3 + $0xd8] sm:$0xff] }
 0x185   :  { %2013 = vst [vmem:[#allocation2 + $0x78] sm:$0xff] %v1981_v45  ;;  %v2578_v43 = vadd.f32 %v2577_v62, %v2523_v12 }
 0x186   :  { %2012 = vst [vmem:[#allocation2 + $0x70] sm:$0xff] %v1980_v13  ;;  %v2580_v22 = vadd.f32 %v2579_v41, %v1840_v49  ;;  %v2376_v3 = vpop.f32.mrb[18].mxu1  ;;  %v2529_v9 = vpop.f32.mrb[20].mxu0 }
 0x187   :  { %v1983_v10 = vmul.f32 %v2578_v43, %v1951_v0  ;;  %v2581_v14 = vadd.f32 %v2376_v3, %v3293_v28  ;;  %v999_v15 = vpop.f32.mrb[19].mxu1  ;;  %v1864_v16 = vpop.f32.mrb[21].mxu0  ;;  %v1960_v0 = vld [vmem:[%s3438_s3 + $0xd0] sm:$0xff] }
 0x188   :  { %v1982_v19 = vmul.f32 %v2580_v22, %v1950_v56  ;;  %v2583_v21 = vadd.f32 %v3293_v28, %v999_v15  ;;  %v1963_v15 = vld [vmem:[%s3438_s3 + $0xe8] sm:$0xff] }
 0x189   :  { %2015 = vst [vmem:[#allocation2 + $0x88] sm:$0xff] %v1983_v10  ;;  %v2582_v24 = vadd.f32 %v2581_v14, %v2526_v39 }
 0x18a   :  { %2014 = vst [vmem:[#allocation2 + $0x80] sm:$0xff] %v1982_v19  ;;  %v2584_v26 = vadd.f32 %v2583_v21, %v1852_v50  ;;  %v2379_v29 = vpop.f32.mrb[20].mxu1  ;;  %v2532_v34 = vpop.f32.mrb[22].mxu0 }
 0x18b   :  { %v1985_v38 = vmul.f32 %v2582_v24, %v1953_v20  ;;  %v2585_v48 = vadd.f32 %v2379_v29, %v3293_v28  ;;  %v1013_v58 = vpop.f32.mrb[21].mxu1  ;;  %v1876_v63 = vpop.f32.mrb[23].mxu0  ;;  %v1962_v20 = vld [vmem:[%s3438_s3 + $0xe0] sm:$0xff] }
 0x18c   :  { %v1984_v5 = vmul.f32 %v2584_v26, %v1952_v25  ;;  %v2587_v30 = vadd.f32 %v3293_v28, %v1013_v58 }
 0x18d   :  { %2017 = vst [vmem:[#allocation2 + $0x98] sm:$0xff] %v1985_v38  ;;  %v2586_v31 = vadd.f32 %v2585_v48, %v2529_v9  ;;  %v1965_v38 = vld [vmem:[%s3438_s3 + $0xf8] sm:$0xff] }
 0x18e   :  { %2016 = vst [vmem:[#allocation2 + $0x90] sm:$0xff] %v1984_v5  ;;  %v2588_v44 = vadd.f32 %v2587_v30, %v1864_v16  ;;  %v2382_v57 = vpop.f32.mrb[22].mxu1  ;;  %v2535_v2 = vpop.f32.mrb[24].mxu0 }
 0x18f   :  { %v1987_v17 = vmul.f32 %v2586_v31, %v1955_v6  ;;  %v2589_v18 = vadd.f32 %v2382_v57, %v3293_v28  ;;  %v1027_v27 = vpop.f32.mrb[23].mxu1  ;;  %v1888_v51 = vpop.f32.mrb[25].mxu0 }
 0x190   :  { %v1986_v52 = vmul.f32 %v2588_v44, %v1954_v40  ;;  %v2591_v8 = vadd.f32 %v3293_v28, %v1027_v27 }
 0x191   :  { %2019 = vst [vmem:[#allocation2 + $0xa8] sm:$0xff] %v1987_v17  ;;  %v2590_v32 = vadd.f32 %v2589_v18, %v2532_v34 }
 0x192   :  { %2018 = vst [vmem:[#allocation2 + $0xa0] sm:$0xff] %v1986_v52  ;;  %v2592_v36 = vadd.f32 %v2591_v8, %v1876_v63  ;;  %v2385_v37 = vpop.f32.mrb[24].mxu1  ;;  %v2538_v35 = vpop.f32.mrb[26].mxu0  ;;  %v1964_v63 = vld [vmem:[%s3438_s3 + $0xf0] sm:$0xff] }
 0x193   :  { %v1989_v53 = vmul.f32 %v2590_v32, %v1957_v4  ;;  %v2593_v33 = vadd.f32 %v2385_v37, %v3293_v28  ;;  %v1041_v12 = vpop.f32.mrb[25].mxu1  ;;  %v1900_v47 = vpop.f32.mrb[27].mxu0 }
 0x194   :  { %v1988_v1 = vmul.f32 %v2592_v36, %v1956_v55  ;;  %v2595_v49 = vadd.f32 %v3293_v28, %v1041_v12 }
 0x195   :  { %2021 = vst [vmem:[#allocation2 + $0xb8] sm:$0xff] %v1989_v53  ;;  %v2594_v46 = vadd.f32 %v2593_v33, %v2535_v2 }
 0x196   :  { %2020 = vst [vmem:[#allocation2 + $0xb0] sm:$0xff] %v1988_v1  ;;  %v2596_v11 = vadd.f32 %v2595_v49, %v1888_v51  ;;  %v2388_v60 = vpop.f32.mrb[26].mxu1  ;;  %v2541_v7 = vpop.f32.mrb[28].mxu0 }
 0x197   :  { %v1991_v42 = vmul.f32 %v2594_v46, %v1959_v59  ;;  %v2597_v54 = vadd.f32 %v2388_v60, %v3293_v28  ;;  %v1055_v39 = vpop.f32.mrb[27].mxu1  ;;  %v1912_v45 = vpop.f32.mrb[29].mxu0 }
 0x198   :  { %v1990_v62 = vmul.f32 %v2596_v11, %v1958_v61  ;;  %v2599_v50 = vadd.f32 %v3293_v28, %v1055_v39 }
 0x199   :  { %2023 = vst [vmem:[#allocation2 + $0xc8] sm:$0xff] %v1991_v42  ;;  %v2598_v13 = vadd.f32 %v2597_v54, %v2538_v35 }
 0x19a   :  { %2022 = vst [vmem:[#allocation2 + $0xc0] sm:$0xff] %v1990_v62  ;;  %v2600_v41 = vadd.f32 %v2599_v50, %v1900_v47  ;;  %v2391_v43 = vpop.f32.mrb[28].mxu1  ;;  %v2544_v56 = vpop.f32.mrb[30].mxu0 }
 0x19b   :  { %v1993_v22 = vmul.f32 %v2598_v13, %v1961_v23  ;;  %v2601_v3 = vadd.f32 %v2391_v43, %v3293_v28  ;;  %v1069_v9 = vpop.f32.mrb[29].mxu1  ;;  %v1924_v10 = vpop.f32.mrb[31].mxu0 }
 0x19c   :  { %v1992_v14 = vmul.f32 %v2600_v41, %v1960_v0  ;;  %v2603_v16 = vadd.f32 %v3293_v28, %v1069_v9 }
 0x19d   :  { %2025 = vst [vmem:[#allocation2 + $0xd8] sm:$0xff] %v1993_v22  ;;  %v2602_v19 = vadd.f32 %v2601_v3, %v2541_v7 }
 0x19e   :  { %2024 = vst [vmem:[#allocation2 + $0xd0] sm:$0xff] %v1992_v14  ;;  %v2604_v21 = vadd.f32 %v2603_v16, %v1912_v45  ;;  %v2394_v24 = vpop.f32.mrb[30].mxu1 }
 0x19f   :  { %v1995_v25 = vmul.f32 %v2602_v19, %v1963_v15  ;;  %v2605_v26 = vadd.f32 %v2394_v24, %v3293_v28  ;;  %v1083_v29 = vpop.f32.mrb[31].mxu1 }
 0x1a0   :  { %v1994_v34 = vmul.f32 %v2604_v21, %v1962_v20  ;;  %v2607_v48 = vadd.f32 %v3293_v28, %v1083_v29 }
 0x1a1   :  { %2027 = vst [vmem:[#allocation2 + $0xe8] sm:$0xff] %v1995_v25  ;;  %v2606_v58 = vadd.f32 %v2605_v26, %v2544_v56 }
 0x1a2   :  { %2026 = vst [vmem:[#allocation2 + $0xe0] sm:$0xff] %v1994_v34  ;;  %v2608_v5 = vadd.f32 %v2607_v48, %v1924_v10 }
 0x1a3   :  { %v1997_v6 = vmul.f32 %v2606_v58, %v1965_v38 }
 0x1a4   :  { %v1996_v30 = vmul.f32 %v2608_v5, %v1964_v63 }
 0x1a5   :  { %2029 = vst [vmem:[#allocation2 + $0xf8] sm:$0xff] %v1997_v6 }
 0x1a6   :  { %2028 = vst [vmem:[#allocation2 + $0xf0] sm:$0xff] %v1996_v30 }
 0x1a7   :  { %2751 = shalt.err (!%p2748_p4)
}
 0x1a8   :  { %s2752_s11 = scalar_lea.hbm %s3439_s4, 4096 }
 0x1a9   :  { %p2753_p5 = scmp.ne.s32.totalorder %s3439_s4, %s2752_s11  ;;  %p2756_p6 = scmp.lt.u32.totalorder %s2752_s11, %s3439_s4 }
 0x1ab   :  { %p2758_p7 = pnand %p2756_p6, %p2753_p5 }
 0x1ad   :  { %2761 = shalt.err (!%p2758_p7)
}
 0x1ae   :  { %s2765_s15 = smov 128   ;;  %s2766_s16 = smov 8  }
 0x1af   :  { %2041 = dma.vmem_to_hbm [thread:$0]  %s2036_s5, 4096, %s3439_s4, [#allocation3], %s2765_s15, %s2765_s15, %s2766_s16  }
 0x1b0   :  { %2762 = dma.done.wait [#allocation3], 4096  }
 0x1b1   :  { %2763 = vsyncadd [#allocation3], 4294963200 }
 0x1b2   :  { %2045 = vsyncpa [#allocation3], 1 }

</bundles_post_ra>
